<compile_context>
chip_gen: v6e
topology: v6e:2x2x1
jax: 0.10.0
libtpu: 0.0.40
codegen_flags: <defaults>
</compile_context>

<pallas_src>
import jax
import jax.numpy as jnp
from jax.experimental import pallas as pl
from jax.experimental.pallas import tpu as pltpu

SCALE = 0.7071067811865476


def _fused_kernel(w_ref, b_ref, xpad_ref, out_ref):
    """Single invocation computing all output channels.

    w_ref, b_ref : SMEM f32[C]        (1x1 conv weight / bias, per output channel)
    xpad_ref     : VMEM f32[Hp, Wp]   (zero-padded single-channel input plane)
    out_ref      : VMEM f32[1, C, Hp, Wp]
    """
    xp = xpad_ref[...]                      # (Hp, Wp) plane, resident in VMEM
    cout = out_ref.shape[1]
    for c in range(cout):                   # static unroll over 3 channels
        wc = w_ref[c]                       # scalar SMEM reads -> sregs (free)
        bc = b_ref[c]
        w2 = wc * SCALE                     # folded coefficients on the scalar unit
        b2 = bc + 1.0
        u = wc * xp + bc                    # v1 = conv(x)  (1x1 conv, padding done outside)
        # v5 = v1 * (conv(v1 * SCALE) + 1) == u * (SCALE*w*u + b + 1)
        out_ref[0, c, :, :] = u * (w2 * u + b2)


@jax.jit
def model_forward(x, w, b):
    """x: (1, 1, H, W) NCHW, w: (3, 1, 1, 1), b: (3,). Returns (1, 3, H+2, W+2) NCHW."""
    n, cin, h, wdt = x.shape
    assert n == 1 and cin == 1
    cout = w.shape[0]

    # padding=1 of the 1x1 conv; fused into this jit-ed executable (no separate dispatch).
    xpad = jnp.pad(x[0, 0], ((1, 1), (1, 1)))
    hp, wp = xpad.shape

    return pl.pallas_call(
        _fused_kernel,
        out_shape=jax.ShapeDtypeStruct((1, cout, hp, wp), x.dtype),
        in_specs=[
            pl.BlockSpec(memory_space=pltpu.MemorySpace.SMEM),   # w (3,)
            pl.BlockSpec(memory_space=pltpu.MemorySpace.SMEM),   # b (3,)
            pl.BlockSpec(memory_space=pltpu.MemorySpace.VMEM),   # padded plane, full block
        ],
        out_specs=pl.BlockSpec(memory_space=pltpu.MemorySpace.VMEM),
    )(w.reshape(cout), b, xpad)


def reference(x, w, b):
    """Pure-JAX reference of the same (shape-consistent) computation."""
    xpad = jnp.pad(x[0, 0], ((1, 1), (1, 1)))
    w_ = w.reshape(-1, 1, 1)
    b_ = b.reshape(-1, 1, 1)
    v1 = w_ * xpad[None] + b_
    v2 = v1 * SCALE
    v3 = w_ * v2 + b_
    v4 = v3 + 1.0
    return (v1 * v4)[None]


if __name__ == "__main__":
    key = jax.random.PRNGKey(0)
    kx, kw, kb = jax.random.split(key, 3)

    # Input matches the module's x1 = torch.randn(1, 1, 64, 64)
    x1 = jax.random.normal(kx, (1, 1, 64, 64), dtype=jnp.float32)

    # Conv2d(1, 3, 1): weight (3, 1, 1, 1), bias (3,). PyTorch default init is
    # uniform(-1/sqrt(fan_in), 1/sqrt(fan_in)) with fan_in = 1.
    w = jax.random.uniform(kw, (3, 1, 1, 1), dtype=jnp.float32, minval=-1.0, maxval=1.0)
    b = jax.random.uniform(kb, (3,), dtype=jnp.float32, minval=-1.0, maxval=1.0)

    out = jax.block_until_ready(model_forward(x1, w, b))
    ref = reference(x1, w, b)

    assert out.shape == (1, 3, 66, 66), out.shape
    assert jnp.allclose(out, ref, atol=1e-5, rtol=1e-5), float(jnp.max(jnp.abs(out - ref)))
    print("KERNEL_OK")
</pallas_src>

<mosaic_0001>
module attributes {stable_mosaic.version = 11 : i64} {
  func.func @_fused_kernel(%arg0: memref<3xf32, #tpu.memory_space<smem>>, %arg1: memref<3xf32, #tpu.memory_space<smem>>, %arg2: memref<66x66xf32, #tpu.memory_space<vmem>>, %arg3: memref<1x3x66x66xf32, #tpu.memory_space<vmem>>) attributes {dimension_semantics = [], scalar_prefetch = 0 : i64, scratch_operands = 0 : i64, tpu.core_type = #tpu.core_type<tc>} {
    %c0 = arith.constant 0 : index
    %c0_0 = arith.constant 0 : index
    %0 = vector.load %arg2[%c0, %c0_0] : memref<66x66xf32, #tpu.memory_space<vmem>>, vector<66x66xf32>
    %c0_1 = arith.constant 0 : index
    %1 = memref.load %arg0[%c0_1] : memref<3xf32, #tpu.memory_space<smem>>
    %c0_2 = arith.constant 0 : index
    %2 = memref.load %arg1[%c0_2] : memref<3xf32, #tpu.memory_space<smem>>
    %cst = arith.constant 0.707106769 : f32
    %3 = arith.mulf %1, %cst : f32
    %cst_3 = arith.constant 1.000000e+00 : f32
    %4 = arith.addf %2, %cst_3 : f32
    %5 = vector.broadcast %1 : f32 to vector<66x66xf32>
    %6 = arith.mulf %5, %0 : vector<66x66xf32>
    %7 = vector.broadcast %2 : f32 to vector<66x66xf32>
    %8 = arith.addf %6, %7 : vector<66x66xf32>
    %9 = vector.broadcast %3 : f32 to vector<66x66xf32>
    %10 = arith.mulf %9, %8 : vector<66x66xf32>
    %11 = vector.broadcast %4 : f32 to vector<66x66xf32>
    %12 = arith.addf %10, %11 : vector<66x66xf32>
    %13 = arith.mulf %8, %12 : vector<66x66xf32>
    %c0_4 = arith.constant 0 : index
    %c0_5 = arith.constant 0 : index
    %c0_6 = arith.constant 0 : index
    %c0_7 = arith.constant 0 : index
    %14 = vector.load %arg3[%c0_4, %c0_5, %c0_6, %c0_7] : memref<1x3x66x66xf32, #tpu.memory_space<vmem>>, vector<1x1x66x66xf32>
    %15 = vector.shape_cast %14 : vector<1x1x66x66xf32> to vector<66x66xf32>
    %16 = vector.shape_cast %13 : vector<66x66xf32> to vector<1x1x66x66xf32>
    tpu.vector_store %arg3[%c0_4, %c0_5, %c0_6, %c0_7], %16 {strides = array<i32>} : memref<1x3x66x66xf32, #tpu.memory_space<vmem>>, vector<1x1x66x66xf32>,
    %c1 = arith.constant 1 : index
    %17 = memref.load %arg0[%c1] : memref<3xf32, #tpu.memory_space<smem>>
    %c1_8 = arith.constant 1 : index
    %18 = memref.load %arg1[%c1_8] : memref<3xf32, #tpu.memory_space<smem>>
    %cst_9 = arith.constant 0.707106769 : f32
    %19 = arith.mulf %17, %cst_9 : f32
    %cst_10 = arith.constant 1.000000e+00 : f32
    %20 = arith.addf %18, %cst_10 : f32
    %21 = vector.broadcast %17 : f32 to vector<66x66xf32>
    %22 = arith.mulf %21, %0 : vector<66x66xf32>
    %23 = vector.broadcast %18 : f32 to vector<66x66xf32>
    %24 = arith.addf %22, %23 : vector<66x66xf32>
    %25 = vector.broadcast %19 : f32 to vector<66x66xf32>
    %26 = arith.mulf %25, %24 : vector<66x66xf32>
    %27 = vector.broadcast %20 : f32 to vector<66x66xf32>
    %28 = arith.addf %26, %27 : vector<66x66xf32>
    %29 = arith.mulf %24, %28 : vector<66x66xf32>
    %c0_11 = arith.constant 0 : index
    %c1_12 = arith.constant 1 : index
    %c0_13 = arith.constant 0 : index
    %c0_14 = arith.constant 0 : index
    %30 = vector.load %arg3[%c0_11, %c1_12, %c0_13, %c0_14] : memref<1x3x66x66xf32, #tpu.memory_space<vmem>>, vector<1x1x66x66xf32>
    %31 = vector.shape_cast %30 : vector<1x1x66x66xf32> to vector<66x66xf32>
    %32 = vector.shape_cast %29 : vector<66x66xf32> to vector<1x1x66x66xf32>
    tpu.vector_store %arg3[%c0_11, %c1_12, %c0_13, %c0_14], %32 {strides = array<i32>} : memref<1x3x66x66xf32, #tpu.memory_space<vmem>>, vector<1x1x66x66xf32>,
    %c2 = arith.constant 2 : index
    %33 = memref.load %arg0[%c2] : memref<3xf32, #tpu.memory_space<smem>>
    %c2_15 = arith.constant 2 : index
    %34 = memref.load %arg1[%c2_15] : memref<3xf32, #tpu.memory_space<smem>>
    %cst_16 = arith.constant 0.707106769 : f32
    %35 = arith.mulf %33, %cst_16 : f32
    %cst_17 = arith.constant 1.000000e+00 : f32
    %36 = arith.addf %34, %cst_17 : f32
    %37 = vector.broadcast %33 : f32 to vector<66x66xf32>
    %38 = arith.mulf %37, %0 : vector<66x66xf32>
    %39 = vector.broadcast %34 : f32 to vector<66x66xf32>
    %40 = arith.addf %38, %39 : vector<66x66xf32>
    %41 = vector.broadcast %35 : f32 to vector<66x66xf32>
    %42 = arith.mulf %41, %40 : vector<66x66xf32>
    %43 = vector.broadcast %36 : f32 to vector<66x66xf32>
    %44 = arith.addf %42, %43 : vector<66x66xf32>
    %45 = arith.mulf %40, %44 : vector<66x66xf32>
    %c0_18 = arith.constant 0 : index
    %c2_19 = arith.constant 2 : index
    %c0_20 = arith.constant 0 : index
    %c0_21 = arith.constant 0 : index
    %46 = vector.load %arg3[%c0_18, %c2_19, %c0_20, %c0_21] : memref<1x3x66x66xf32, #tpu.memory_space<vmem>>, vector<1x1x66x66xf32>
    %47 = vector.shape_cast %46 : vector<1x1x66x66xf32> to vector<66x66xf32>
    %48 = vector.shape_cast %45 : vector<66x66xf32> to vector<1x1x66x66xf32>
    tpu.vector_store %arg3[%c0_18, %c2_19, %c0_20, %c0_21], %48 {strides = array<i32>} : memref<1x3x66x66xf32, #tpu.memory_space<vmem>>, vector<1x1x66x66xf32>,
    return
  }
}

</mosaic_0001>

<bundles_post_ra>
// kernel: model_forward.1
= control target key start
LH: loop header
LB: loop body
LE: loop exit
PB: predicated region body
PF: predicated region fallthrough
CT: control target
= control target key end

     0   :  { %8 = vsyncpa [#allocation3], 0  ;;  %s575_s0 = inlined_call_operand.vmem [shape: f32[3], index: 0, kind: input, shape index: {}]   ;;  %s576_s1 = inlined_call_operand.vmem [shape: f32[3], index: 1, kind: input, shape index: {}]   ;;  %s577_s2 = inlined_call_operand.vmem [shape: f32[66,66], index: 2, kind: input, shape index: {}]   ;;  %s578_s3 = inlined_call_operand.vmem [shape: f32[1,3,66,66], index: 3, kind: output, shape index: {}]  }
   0x1   :  { %s16_s14 = sshll.u32 %s575_s0, 4  ;;  %s17_s14 = int_to_ptr.vmem [resolvable:$true] %s16_s14 }
   0x2   :  { %9 = vsyncpa [#allocation5], 0  ;;  %s26_s17 = sshll.u32 %s576_s1, 4  ;;  %s268_s18 = scalar_lea.vmem %s17_s14, 16  ;;  %s27_s17 = int_to_ptr.vmem [resolvable:$true] %s26_s17 }
   0x3   :  { %p269_p0 = scmp.ne.s32.totalorder %s17_s14, %s268_s18  ;;  %p273_p1 = scmp.lt.s32.totalorder %s17_s14, %s17_s14 }
   0x4   :  { %p274_p2 = scmp.lt.s32.totalorder %s268_s18, %s268_s18 }
   0x6   :  { %p275_p3 = por %p274_p2, %p273_p1 }
   0x8   :  { %p276_p4 = pnand %p275_p3, %p269_p0 }
   0xa   :  { %279 = shalt.err (!%p276_p4)
}
   0xb   :  { %s296_s19 = smov [#allocation2]   ;;  %s280_s20 = scalar_lea.vmem %s27_s17, 16 }
   0xc   :  { %19 = dma.vmem_to_smem %s17_s14, 16, %s296_s19, [#allocation3]  }
   0xd   :  { %p281_p5 = scmp.ne.s32.totalorder %s27_s17, %s280_s20  ;;  %p285_p6 = scmp.lt.s32.totalorder %s27_s17, %s27_s17 }
   0xe   :  { %p286_p7 = scmp.lt.s32.totalorder %s280_s20, %s280_s20 }
  0x10   :  { %p287_p8 = por %p286_p7, %p285_p6 }
  0x12   :  { %p288_p9 = pnand %p287_p8, %p281_p5 }
  0x14   :  { %291 = shalt.err (!%p288_p9)
}
  0x15   :  { %s297_s0 = smov [#allocation4]  }
  0x16   :  { %29 = dma.vmem_to_smem %s27_s17, 16, %s297_s0, [#allocation5]  }
  0x17   :  { %292 = dma.done.wait [#allocation3], 16  }
  0x18   :  { %293 = vsyncadd [#allocation3], 4294967280 }
  0x19   :  { %294 = dma.done.wait [#allocation5], 16  }
  0x1a   :  { %295 = vsyncadd [#allocation5], 4294967280 }
  0x1b   :  { %38 = sfence }
  0x1c   :  { %s48_s1 = sld [smem:[#allocation2]]  ;;  %v327_v0 = vld [vmem:[%s577_s2] sm:$0xff]  ;;  %v332_v1 = vld [vmem:[%s577_s2 + $0x8] sm:$0xff]  ;;  %v337_v2 = vld [vmem:[%s577_s2 + $0x10] sm:$0xff]  ;;  %vm101_vm0 = vcmask 539648   ;;  %vm110_vm1 = vcmask 533504  }
  0x1d   :  { %s49_s21 = sld [smem:[#allocation4]]  ;;  %v342_v3 = vld [vmem:[%s577_s2 + $0x18] sm:$0xff]  ;;  %v347_v4 = vld [vmem:[%s577_s2 + $0x20] sm:$0xff]  ;;  %v352_v5 = vld [vmem:[%s577_s2 + $0x28] sm:$0xff] }
  0x1e   :  { %s354_s8 = sld [smem:[#allocation2 + $0x1]]  ;;  %v362_v11 = vld [vmem:[%s577_s2 + $0x30] sm:$0xff]  ;;  %v372_v16 = vld [vmem:[%s577_s2 + $0x38] sm:$0xff]  ;;  %v396_v41 = vld [vmem:[%s577_s2 + $0x40] sm:$0x3] }
  0x1f   :  { %s374_s14 = sld [smem:[#allocation4 + $0x1]] }
  0x20   :  { %s439_s28 = sld [smem:[#allocation2 + $0x2]] }
  0x21   :  { %s449_s4 = sld [smem:[#allocation4 + $0x2]] }
  0x22   :  { %s50_s7 = smul.f32 0.70710677, %s48_s1  ;;  %v52_v6 = vstv %s48_s1 }
  0x23   :  { %s51_s9 = sadd.f32 1.0, %s49_s21  ;;  %v53_v7 = vmul.f32 %v52_v6, %v327_v0  ;;  %v62_v8 = vstv %s49_s21  ;;  %v54_v9 = vmul.f32 %v52_v6, %v332_v1  ;;  %v55_v10 = vmul.f32 %v52_v6, %v337_v2 }
  0x24   :  { %v364_v12 = vstv %s50_s7  ;;  %v56_v13 = vmul.f32 %v52_v6, %v342_v3  ;;  %v57_v14 = vmul.f32 %v52_v6, %v347_v4  ;;  %v58_v15 = vmul.f32 %v52_v6, %v352_v5  ;;  %s114_s17 = smul.f32 0.70710677, %s354_s8 }
  0x25   :  { %v63_v17 = vadd.f32 %v62_v8, %v53_v7  ;;  %v376_v18 = vstv %s51_s9  ;;  %v64_v19 = vadd.f32 %v62_v8, %v54_v9  ;;  %v65_v20 = vadd.f32 %v62_v8, %v55_v10  ;;  %s115_s18 = sadd.f32 1.0, %s374_s14 }
  0x26   :  { %v66_v21 = vadd.f32 %v62_v8, %v56_v13  ;;  %v67_v22 = vadd.f32 %v62_v8, %v57_v14  ;;  %v68_v23 = vadd.f32 %v62_v8, %v58_v15  ;;  %v59_v24 = vmul.f32 %v52_v6, %v362_v11  ;;  %s177_s7 = smul.f32 0.70710677, %s439_s28 }
  0x27   :  { %v73_v25 = vmul.f32 %v364_v12, %v63_v17  ;;  %v74_v26 = vmul.f32 %v364_v12, %v64_v19  ;;  %v75_v27 = vmul.f32 %v364_v12, %v65_v20  ;;  %v60_v28 = vmul.f32 %v52_v6, %v372_v16 }
  0x28   :  { %v76_v29 = vmul.f32 %v364_v12, %v66_v21  ;;  %v77_v30 = vmul.f32 %v364_v12, %v67_v22  ;;  %v78_v31 = vmul.f32 %v364_v12, %v68_v23  ;;  %v69_v32 = vadd.f32 %v62_v8, %v59_v24 }
  0x29   :  { %v83_v33 = vadd.f32 %v376_v18, %v73_v25  ;;  %v84_v34 = vadd.f32 %v376_v18, %v74_v26  ;;  %v85_v35 = vadd.f32 %v376_v18, %v75_v27  ;;  %v70_v36 = vadd.f32 %v62_v8, %v60_v28 }
  0x2a   :  { %v86_v37 = vadd.f32 %v376_v18, %v76_v29  ;;  %v87_v38 = vadd.f32 %v376_v18, %v77_v30  ;;  %v88_v39 = vadd.f32 %v376_v18, %v78_v31  ;;  %v79_v40 = vmul.f32 %v364_v12, %v69_v32 }
  0x2b   :  { %v92_v42 = vmul.f32 %v83_v33, %v63_v17  ;;  %v93_v43 = vmul.f32 %v84_v34, %v64_v19  ;;  %v94_v44 = vmul.f32 %v85_v35, %v65_v20  ;;  %v80_v45 = vmul.f32 %v364_v12, %v70_v36 }
  0x2c   :  { %v95_v46 = vmul.f32 %v86_v37, %v66_v21  ;;  %v96_v47 = vmul.f32 %v87_v38, %v67_v22  ;;  %v97_v48 = vmul.f32 %v88_v39, %v68_v23  ;;  %v89_v49 = vadd.f32 %v376_v18, %v79_v40 }
  0x2d   :  { %102 = vst.msk [vmem:[%s578_s3] sm:$0xff] %vm101_vm0, %v92_v42  ;;  %103 = vst.msk [vmem:[%s578_s3 + $0x8] sm:$0xff] %vm101_vm0, %v93_v43  ;;  %v90_v50 = vadd.f32 %v376_v18, %v80_v45  ;;  %v61_v51 = vmul.f32 %v52_v6, %v396_v41  ;;  %v116_v52 = vstv %s354_s8  ;;  %v418_v53 = vstv %s374_s14  ;;  %s178_s8 = sadd.f32 1.0, %s449_s4 }
  0x2e   :  { %104 = vst.msk [vmem:[%s578_s3 + $0x10] sm:$0xff] %vm101_vm0, %v94_v44  ;;  %105 = vst.msk [vmem:[%s578_s3 + $0x18] sm:$0xff] %vm101_vm0, %v95_v46  ;;  %v98_v54 = vmul.f32 %v89_v49, %v69_v32  ;;  %v117_v55 = vmul.f32 %v116_v52, %v327_v0  ;;  %v433_v56 = vstv %s114_s17  ;;  %v435_v57 = vstv %s115_s18 }
  0x2f   :  { %106 = vst.msk [vmem:[%s578_s3 + $0x20] sm:$0xff] %vm101_vm0, %v96_v47  ;;  %107 = vst.msk [vmem:[%s578_s3 + $0x28] sm:$0xff] %vm101_vm0, %v97_v48  ;;  %v99_v58 = vmul.f32 %v90_v50, %v70_v36  ;;  %v71_v59 = vadd.f32 %v62_v8, %v61_v51  ;;  %v118_v60 = vmul.f32 %v116_v52, %v332_v1  ;;  %v179_v45 = vstv %s439_s28 }
  0x30   :  { %v119_v61 = vmul.f32 %v116_v52, %v337_v2  ;;  %108 = vst.msk [vmem:[%s578_s3 + $0x30] sm:$0xff] %vm101_vm0, %v98_v54  ;;  %v127_v62 = vadd.f32 %v418_v53, %v117_v55  ;;  %v120_v63 = vmul.f32 %v116_v52, %v342_v3  ;;  %v121_v6 = vmul.f32 %v116_v52, %v347_v4 }
  0x31   :  { %v122_v7 = vmul.f32 %v116_v52, %v352_v5  ;;  %109 = vst.msk [vmem:[%s578_s3 + $0x38] sm:$0xff] %vm101_vm0, %v99_v58  ;;  %v81_v8 = vmul.f32 %v364_v12, %v71_v59  ;;  %v128_v9 = vadd.f32 %v418_v53, %v118_v60  ;;  %v123_v13 = vmul.f32 %v116_v52, %v362_v11 }
  0x32   :  { %v129_v10 = vadd.f32 %v418_v53, %v119_v61  ;;  %v137_v14 = vmul.f32 %v433_v56, %v127_v62  ;;  %v130_v15 = vadd.f32 %v418_v53, %v120_v63  ;;  %v131_v17 = vadd.f32 %v418_v53, %v121_v6 }
  0x33   :  { %v132_v19 = vadd.f32 %v418_v53, %v122_v7  ;;  %v91_v20 = vadd.f32 %v376_v18, %v81_v8  ;;  %v138_v21 = vmul.f32 %v433_v56, %v128_v9  ;;  %v133_v22 = vadd.f32 %v418_v53, %v123_v13 }
  0x34   :  { %v139_v12 = vmul.f32 %v433_v56, %v129_v10  ;;  %v147_v23 = vadd.f32 %v435_v57, %v137_v14  ;;  %v140_v24 = vmul.f32 %v433_v56, %v130_v15  ;;  %v141_v25 = vmul.f32 %v433_v56, %v131_v17 }
  0x35   :  { %v142_v26 = vmul.f32 %v433_v56, %v132_v19  ;;  %v100_v27 = vmul.f32 %v91_v20, %v71_v59  ;;  %v148_v28 = vadd.f32 %v435_v57, %v138_v21  ;;  %v143_v29 = vmul.f32 %v433_v56, %v133_v22 }
  0x36   :  { %v149_v18 = vadd.f32 %v435_v57, %v139_v12  ;;  %v156_v30 = vmul.f32 %v147_v23, %v127_v62  ;;  %v150_v31 = vadd.f32 %v435_v57, %v140_v24  ;;  %v151_v32 = vadd.f32 %v435_v57, %v141_v25 }
  0x37   :  { %v152_v33 = vadd.f32 %v435_v57, %v142_v26  ;;  %111 = vst.msk [vmem:[%s578_s3 + $0x40] sm:$0x3] %vm110_vm1, %v100_v27  ;;  %v157_v34 = vmul.f32 %v148_v28, %v128_v9  ;;  %v153_v36 = vadd.f32 %v435_v57, %v143_v29  ;;  %v124_v37 = vmul.f32 %v116_v52, %v372_v16 }
  0x38   :  { %v158_v35 = vmul.f32 %v149_v18, %v129_v10  ;;  %246 = vst.msk [vmem:[%s578_s3 + $0x48] sm:$0xff] %vm101_vm0, %v156_v30  ;;  %v159_v38 = vmul.f32 %v150_v31, %v130_v15  ;;  %v160_v39 = vmul.f32 %v151_v32, %v131_v17  ;;  %v125_v42 = vmul.f32 %v116_v52, %v396_v41 }
  0x39   :  { %v161_v40 = vmul.f32 %v152_v33, %v132_v19  ;;  %247 = vst.msk [vmem:[%s578_s3 + $0x50] sm:$0xff] %vm101_vm0, %v157_v34  ;;  %v162_v43 = vmul.f32 %v153_v36, %v133_v22  ;;  %v134_v44 = vadd.f32 %v418_v53, %v124_v37  ;;  %v189_v46 = vstv %s449_s4 }
  0x3a   :  { %248 = vst.msk [vmem:[%s578_s3 + $0x58] sm:$0xff] %vm101_vm0, %v158_v35  ;;  %249 = vst.msk [vmem:[%s578_s3 + $0x60] sm:$0xff] %vm101_vm0, %v159_v38  ;;  %v135_v47 = vadd.f32 %v418_v53, %v125_v42  ;;  %v180_v48 = vmul.f32 %v179_v45, %v327_v0  ;;  %v199_v49 = vstv %s177_s7  ;;  %v209_v50 = vstv %s178_s8 }
  0x3b   :  { %250 = vst.msk [vmem:[%s578_s3 + $0x68] sm:$0xff] %vm101_vm0, %v160_v39  ;;  %251 = vst.msk [vmem:[%s578_s3 + $0x70] sm:$0xff] %vm101_vm0, %v161_v40  ;;  %v144_v51 = vmul.f32 %v433_v56, %v134_v44  ;;  %v181_v52 = vmul.f32 %v179_v45, %v332_v1  ;;  %v182_v54 = vmul.f32 %v179_v45, %v337_v2 }
  0x3c   :  { %252 = vst.msk [vmem:[%s578_s3 + $0x78] sm:$0xff] %vm101_vm0, %v162_v43  ;;  %v183_v55 = vmul.f32 %v179_v45, %v342_v3  ;;  %v145_v58 = vmul.f32 %v433_v56, %v135_v47  ;;  %v190_v53 = vadd.f32 %v189_v46, %v180_v48  ;;  %v184_v0 = vmul.f32 %v179_v45, %v347_v4 }
  0x3d   :  { %v185_v59 = vmul.f32 %v179_v45, %v352_v5  ;;  %v154_v60 = vadd.f32 %v435_v57, %v144_v51  ;;  %v191_v61 = vadd.f32 %v189_v46, %v181_v52  ;;  %v192_v62 = vadd.f32 %v189_v46, %v182_v54 }
  0x3e   :  { %v193_v63 = vadd.f32 %v189_v46, %v183_v55  ;;  %v155_v6 = vadd.f32 %v435_v57, %v145_v58  ;;  %v200_v7 = vmul.f32 %v199_v49, %v190_v53  ;;  %v194_v1 = vadd.f32 %v189_v46, %v184_v0 }
  0x3f   :  { %v195_v8 = vadd.f32 %v189_v46, %v185_v59  ;;  %v163_v2 = vmul.f32 %v154_v60, %v134_v44  ;;  %v201_v9 = vmul.f32 %v199_v49, %v191_v61  ;;  %v202_v3 = vmul.f32 %v199_v49, %v192_v62 }
  0x40   :  { %v203_v10 = vmul.f32 %v199_v49, %v193_v63  ;;  %v164_v56 = vmul.f32 %v155_v6, %v135_v47  ;;  %v210_v13 = vadd.f32 %v209_v50, %v200_v7  ;;  %v204_v14 = vmul.f32 %v199_v49, %v194_v1 }
  0x41   :  { %v205_v4 = vmul.f32 %v199_v49, %v195_v8  ;;  %253 = vst.msk [vmem:[%s578_s3 + $0x80] sm:$0xff] %vm101_vm0, %v163_v2  ;;  %v211_v5 = vadd.f32 %v209_v50, %v201_v9  ;;  %v212_v15 = vadd.f32 %v209_v50, %v202_v3  ;;  %v186_v57 = vmul.f32 %v179_v45, %v362_v11 }
  0x42   :  { %v213_v17 = vadd.f32 %v209_v50, %v203_v10  ;;  %254 = vst.msk [vmem:[%s578_s3 + $0x88] sm:$0x3] %vm110_vm1, %v164_v56  ;;  %v219_v19 = vmul.f32 %v210_v13, %v190_v53  ;;  %v214_v20 = vadd.f32 %v209_v50, %v204_v14  ;;  %v187_v12 = vmul.f32 %v179_v45, %v372_v16 }
  0x43   :  { %v215_v21 = vadd.f32 %v209_v50, %v205_v4  ;;  %v220_v22 = vmul.f32 %v211_v5, %v191_v61  ;;  %v221_v23 = vmul.f32 %v212_v15, %v192_v62  ;;  %v196_v25 = vadd.f32 %v189_v46, %v186_v57 }
  0x44   :  { %v222_v24 = vmul.f32 %v213_v17, %v193_v63  ;;  %257 = vst.msk [vmem:[%s578_s3 + $0x90] sm:$0xff] %vm101_vm0, %v219_v19  ;;  %v223_v11 = vmul.f32 %v214_v20, %v194_v1  ;;  %v197_v27 = vadd.f32 %v189_v46, %v187_v12  ;;  %v188_v28 = vmul.f32 %v179_v45, %v396_v41 }
  0x45   :  { %v224_v26 = vmul.f32 %v215_v21, %v195_v8  ;;  %258 = vst.msk [vmem:[%s578_s3 + $0x98] sm:$0xff] %vm101_vm0, %v220_v22  ;;  %259 = vst.msk [vmem:[%s578_s3 + $0xa0] sm:$0xff] %vm101_vm0, %v221_v23  ;;  %v206_v16 = vmul.f32 %v199_v49, %v196_v25 }
  0x46   :  { %260 = vst.msk [vmem:[%s578_s3 + $0xa8] sm:$0xff] %vm101_vm0, %v222_v24  ;;  %261 = vst.msk [vmem:[%s578_s3 + $0xb0] sm:$0xff] %vm101_vm0, %v223_v11  ;;  %v207_v41 = vmul.f32 %v199_v49, %v197_v27  ;;  %v198_v18 = vadd.f32 %v189_v46, %v188_v28 }
  0x47   :  { %262 = vst.msk [vmem:[%s578_s3 + $0xb8] sm:$0xff] %vm101_vm0, %v224_v26  ;;  %v216_v29 = vadd.f32 %v209_v50, %v206_v16 }
  0x48   :  { %v217_v30 = vadd.f32 %v209_v50, %v207_v41  ;;  %v208_v31 = vmul.f32 %v199_v49, %v198_v18 }
  0x49   :  { %v225_v32 = vmul.f32 %v216_v29, %v196_v25 }
  0x4a   :  { %v226_v33 = vmul.f32 %v217_v30, %v197_v27  ;;  %v218_v34 = vadd.f32 %v209_v50, %v208_v31 }
  0x4b   :  { %263 = vst.msk [vmem:[%s578_s3 + $0xc0] sm:$0xff] %vm101_vm0, %v225_v32 }
  0x4c   :  { %264 = vst.msk [vmem:[%s578_s3 + $0xc8] sm:$0xff] %vm101_vm0, %v226_v33  ;;  %v227_v35 = vmul.f32 %v218_v34, %v198_v18 }
  0x4e   :  { %265 = vst.msk [vmem:[%s578_s3 + $0xd0] sm:$0x3] %vm110_vm1, %v227_v35 }
  0x4f   :  { %242 = vsyncpa [#allocation3], 1 }
  0x50   :  { %243 = vsyncpa [#allocation5], 1 }

</bundles_post_ra>
